<compile_context>
chip_gen: v6e
topology: v6e:2x2x1
jax: 0.10.0
libtpu: 0.0.40
codegen_flags: <defaults>
</compile_context>

<pallas_src>
import jax
import jax.numpy as jnp
from jax.experimental import pallas as pl
from jax.experimental.pallas import tpu as pltpu


def lm_kernel(gath_ref,      # VMEM (TM, E)  bf16  -- gathered embedding rows
              embT_ref,      # VMEM (E, TV)  bf16  -- streamed tied-weight tile
              wenc_ref,      # VMEM (E, H)   bf16  -- resident encoder weight
              benc_ref,      # VMEM (1, H)   f32
              bout_ref,      # VMEM (1, TV)  f32   -- output-bias slice
              out_ref,       # VMEM (TM, TV) f32   -- logits tile
              enc_cache):    # VMEM (TM, H)  bf16 scratch (cached tanh encoding)
    j = pl.program_id(1)     # vocab column tile (innermost, sequential)

    # ---- per-row-tile encoder (only on the first vocab tile) ----------------
    # enc = tanh(embed @ W_enc + b_enc); dropout p=0 -> identity.
    @pl.when(j == 0)
    def _():
        pre = jnp.dot(gath_ref[...], wenc_ref[...],
                      preferred_element_type=jnp.float32) + benc_ref[...]
        enc_cache[...] = jnp.tanh(pre).astype(jnp.bfloat16)

    # ---- tied output layer on this vocab tile: enc @ emb.T + b_out ----------
    # emb_T is pre-transposed in the wrapper, so this is a native (M,K)x(K,N).
    out_ref[...] = jnp.dot(enc_cache[...], embT_ref[...],
                           preferred_element_type=jnp.float32) + bout_ref[...]


def language_model_forward(data, emb, w_enc, b_enc, b_out, *, tm=512, tv=1024):
    """data: (seq_len, batch) int32. Returns (seq_len, batch, V) float32."""
    seq_len, batch = data.shape
    V, E = emb.shape
    H = w_enc.shape[1]
    N = seq_len * batch

    TM = min(tm, N)
    TV = min(tv, V)
    assert N % TM == 0 and V % TV == 0, "tile sizes must divide N and V"
    assert (TM % 8 == 0) or (TM == N), "row tile must satisfy sublane constraint"
    assert TV % 128 == 0, "vocab tile must be lane-dense (multiple of 128)"
    assert H == E, "weight tying requires encoder output dim == embedding dim"

    tokens = data.reshape(N).astype(jnp.int32)
    # XLA gather in the wrapper (one blocked read per row tile downstream);
    # matmul operands are bf16 with f32 accumulation.
    gathered = emb[tokens].astype(jnp.bfloat16)          # (N, E)
    emb_T = emb.T.astype(jnp.bfloat16)                   # (E, V) tied weights
    wenc_bf16 = w_enc.astype(jnp.bfloat16)               # (E, H)
    benc2d = b_enc.reshape(1, H).astype(jnp.float32)
    bout2d = b_out.reshape(1, V).astype(jnp.float32)

    grid = (N // TM, V // TV)

    cost = pl.CostEstimate(
        flops=2 * N * E * H + 2 * N * H * V,
        transcendentals=N * H,
        bytes_accessed=(N * E * 2                 # gathered embedding rows
                        + grid[0] * V * E * 2     # bf16 emb.T streamed per row tile
                        + E * H * 2               # encoder weight
                        + N * V * 4               # logits out (f32)
                        + V * 4 + H * 4),         # biases
    )

    logits = pl.pallas_call(
        lm_kernel,
        out_shape=jax.ShapeDtypeStruct((N, V), jnp.float32),
        grid_spec=pltpu.PrefetchScalarGridSpec(
            num_scalar_prefetch=0,
            grid=grid,
            in_specs=[
                pl.BlockSpec((TM, E), lambda i, j: (i, 0)),   # gathered rows
                pl.BlockSpec((E, TV), lambda i, j: (0, j)),   # emb.T vocab tile
                pl.BlockSpec((E, H), lambda i, j: (0, 0)),    # w_enc (resident)
                pl.BlockSpec((1, H), lambda i, j: (0, 0)),    # b_enc
                pl.BlockSpec((1, TV), lambda i, j: (0, j)),   # b_out slice
            ],
            out_specs=pl.BlockSpec((TM, TV), lambda i, j: (i, j)),
            scratch_shapes=[
                pltpu.VMEM((TM, H), jnp.bfloat16),            # cached encoding
            ],
        ),
        compiler_params=pltpu.CompilerParams(
            # vocab axis MUST stay innermost + "arbitrary": enc_cache is reused
            # across it via pl.when(j == 0).
            dimension_semantics=("parallel", "arbitrary"),
            vmem_limit_bytes=32 * 1024 * 1024,
        ),
        cost_estimate=cost,
    )(gathered, emb_T, wenc_bf16, benc2d, bout2d)

    # PyTorch forward returns seq_len x batch_size x n_out
    return logits.reshape(seq_len, batch, V)


def language_model_reference(data, emb, w_enc, b_enc, b_out):
    """Pure-JAX reference mirroring the PyTorch semantics (target=None path)."""
    embed = emb[data]                                   # (S, B, E)
    enc = jnp.tanh(embed @ w_enc + b_enc)               # (S, B, H)
    # mask = (data != pad_index) is computed in PyTorch but unused when target is None
    return enc @ emb.T + b_out                          # tied weights


if __name__ == "__main__":
    # Small, TPU-friendly shapes (grid = (1, 2): exercises both the cached
    # encoder path and the streamed vocab tiles).
    seq_len, batch = 8, 2
    vocab = 2048    # n_out == vocab (tied weights)
    embed_dim = 128
    hidden = 128    # must equal embed_dim for weight tying

    key = jax.random.PRNGKey(0)
    k_tok, k_emb, k_wenc, k_benc, k_bout = jax.random.split(key, 5)

    data = jax.random.randint(k_tok, (seq_len, batch), 0, vocab, dtype=jnp.int32)
    emb = jax.random.normal(k_emb, (vocab, embed_dim), jnp.float32) * 0.1
    w_enc = jax.random.normal(k_wenc, (embed_dim, hidden), jnp.float32) * 0.1
    b_enc = jax.random.normal(k_benc, (hidden,), jnp.float32) * 0.01
    b_out = jax.random.normal(k_bout, (vocab,), jnp.float32) * 0.01

    pred = language_model_forward(data, emb, w_enc, b_enc, b_out, tm=512, tv=1024)
    pred = jax.block_until_ready(pred)

    ref = language_model_reference(data, emb, w_enc, b_enc, b_out)
    assert pred.shape == (seq_len, batch, vocab)
    # bf16 matmul operands (f32 accumulation) -> loosened tolerance vs f32 reference.
    max_diff = jnp.max(jnp.abs(pred - ref))
    assert jnp.allclose(pred, ref, rtol=2e-2, atol=2e-2), (
        f"mismatch vs reference: max|diff|={max_diff}")

    print("KERNEL_OK")
</pallas_src>

<mosaic_0001>
module attributes {stable_mosaic.version = 11 : i64} {
  func.func @lm_kernel(%arg0: i32, %arg1: i32, %arg2: memref<16x128xbf16, #tpu.memory_space<vmem>>, %arg3: memref<128x1024xbf16, #tpu.memory_space<vmem>>, %arg4: memref<128x128xbf16, #tpu.memory_space<vmem>>, %arg5: memref<1x128xf32, #tpu.memory_space<vmem>>, %arg6: memref<1x1024xf32, #tpu.memory_space<vmem>>, %arg7: memref<16x1024xf32, #tpu.memory_space<vmem>>, %arg8: memref<16x128xbf16, #tpu.memory_space<vmem>>) attributes {dimension_semantics = [#tpu.dimension_semantics<parallel>, #tpu.dimension_semantics<arbitrary>], iteration_bounds = array<i64: 1, 2>, scalar_prefetch = 0 : i64, scratch_operands = 1 : i64, tpu.core_type = #tpu.core_type<tc>, window_params = [{transform_indices = @transform_0, window_bounds = array<i64: 16, 128>}, {transform_indices = @transform_1, window_bounds = array<i64: 128, 1024>}, {pipeline_mode = #tpu.pipeline_mode<synchronous>, transform_indices = @transform_2, window_bounds = array<i64: 128, 128>}, {pipeline_mode = #tpu.pipeline_mode<synchronous>, transform_indices = @transform_3, window_bounds = array<i64: 1, 128>}, {transform_indices = @transform_4, window_bounds = array<i64: 1, 1024>}, {transform_indices = @transform_5, window_bounds = array<i64: 16, 1024>}]} {
    %c0_i32 = arith.constant 0 : i32
    %0 = arith.cmpi eq, %arg1, %c0_i32 : i32
    %1 = arith.extui %0 : i1 to i32
    %c0_i32_0 = arith.constant 0 : i32
    %2 = arith.cmpi ne, %1, %c0_i32_0 : i32
    scf.if %2 {
      %c0_8 = arith.constant 0 : index
      %c0_9 = arith.constant 0 : index
      %10 = vector.load %arg2[%c0_8, %c0_9] : memref<16x128xbf16, #tpu.memory_space<vmem>>, vector<16x128xbf16>
      %c0_10 = arith.constant 0 : index
      %c0_11 = arith.constant 0 : index
      %11 = vector.load %arg4[%c0_10, %c0_11] : memref<128x128xbf16, #tpu.memory_space<vmem>>, vector<128x128xbf16>
      %cst_12 = arith.constant dense<0.000000e+00> : vector<16x128xf32>
      %12 = tpu.matmul %10, %11, %cst_12 {dimension_numbers = #tpu.dot_dimension_numbers<[1], [0], [0], [1], [0, 0, 1, 1], [], []>} : vector<16x128xbf16>, vector<128x128xbf16>, vector<16x128xf32> -> vector<16x128xf32>
      %c0_13 = arith.constant 0 : index
      %c0_14 = arith.constant 0 : index
      %13 = vector.load %arg5[%c0_13, %c0_14] : memref<1x128xf32, #tpu.memory_space<vmem>>, vector<1x128xf32>
      %14 = vector.broadcast %13 : vector<1x128xf32> to vector<16x128xf32>
      %15 = arith.addf %12, %14 : vector<16x128xf32>
      %16 = math.tanh %15 : vector<16x128xf32>
      %17 = arith.truncf %16 : vector<16x128xf32> to vector<16x128xbf16>
      %c0_15 = arith.constant 0 : index
      %c0_16 = arith.constant 0 : index
      %18 = vector.load %arg8[%c0_15, %c0_16] : memref<16x128xbf16, #tpu.memory_space<vmem>>, vector<16x128xbf16>
      tpu.vector_store %arg8[%c0_15, %c0_16], %17 {strides = array<i32>} : memref<16x128xbf16, #tpu.memory_space<vmem>>, vector<16x128xbf16>,
    } else {
    }
    %c0 = arith.constant 0 : index
    %c0_1 = arith.constant 0 : index
    %3 = vector.load %arg8[%c0, %c0_1] : memref<16x128xbf16, #tpu.memory_space<vmem>>, vector<16x128xbf16>
    %c0_2 = arith.constant 0 : index
    %c0_3 = arith.constant 0 : index
    %4 = vector.load %arg3[%c0_2, %c0_3] : memref<128x1024xbf16, #tpu.memory_space<vmem>>, vector<128x1024xbf16>
    %cst = arith.constant dense<0.000000e+00> : vector<16x1024xf32>
    %5 = tpu.matmul %3, %4, %cst {dimension_numbers = #tpu.dot_dimension_numbers<[1], [0], [0], [1], [0, 0, 1, 1], [], []>} : vector<16x128xbf16>, vector<128x1024xbf16>, vector<16x1024xf32> -> vector<16x1024xf32>
    %c0_4 = arith.constant 0 : index
    %c0_5 = arith.constant 0 : index
    %6 = vector.load %arg6[%c0_4, %c0_5] : memref<1x1024xf32, #tpu.memory_space<vmem>>, vector<1x1024xf32>
    %7 = vector.broadcast %6 : vector<1x1024xf32> to vector<16x1024xf32>
    %8 = arith.addf %5, %7 : vector<16x1024xf32>
    %c0_6 = arith.constant 0 : index
    %c0_7 = arith.constant 0 : index
    %9 = vector.load %arg7[%c0_6, %c0_7] : memref<16x1024xf32, #tpu.memory_space<vmem>>, vector<16x1024xf32>
    tpu.vector_store %arg7[%c0_6, %c0_7], %8 {strides = array<i32>} : memref<16x1024xf32, #tpu.memory_space<vmem>>, vector<16x1024xf32>,
    return
  }
  func.func @transform_0(%arg0: i32, %arg1: i32) -> (i32, i32) {
    %c0_i32 = arith.constant 0 : i32
    %c0_i32_0 = arith.constant 0 : i32
    return %arg0, %c0_i32 : i32, i32
  }
  func.func @transform_1(%arg0: i32, %arg1: i32) -> (i32, i32) {
    %c0_i32 = arith.constant 0 : i32
    %c0_i32_0 = arith.constant 0 : i32
    return %c0_i32, %arg1 : i32, i32
  }
  func.func @transform_2(%arg0: i32, %arg1: i32) -> (i32, i32) {
    %c0_i32 = arith.constant 0 : i32
    %c0_i32_0 = arith.constant 0 : i32
    %c0_i32_1 = arith.constant 0 : i32
    return %c0_i32, %c0_i32_0 : i32, i32
  }
  func.func @transform_3(%arg0: i32, %arg1: i32) -> (i32, i32) {
    %c0_i32 = arith.constant 0 : i32
    %c0_i32_0 = arith.constant 0 : i32
    %c0_i32_1 = arith.constant 0 : i32
    return %c0_i32, %c0_i32_0 : i32, i32
  }
  func.func @transform_4(%arg0: i32, %arg1: i32) -> (i32, i32) {
    %c0_i32 = arith.constant 0 : i32
    %c0_i32_0 = arith.constant 0 : i32
    return %c0_i32, %arg1 : i32, i32
  }
  func.func @transform_5(%arg0: i32, %arg1: i32) -> (i32, i32) {
    %c0_i32 = arith.constant 0 : i32
    return %arg0, %arg1 : i32, i32
  }
}

</mosaic_0001>

<bundles_post_ra>
// kernel: tpu_custom_call.1
= control target key start
LH: loop header
LB: loop body
LE: loop exit
PB: predicated region body
PF: predicated region fallthrough
CT: control target
= control target key end

     0   :  { %s2066_s0 = inlined_call_operand.hbm [shape: bf16[16,128], index: 0, kind: input, shape index: {}]   ;;  %s2067_s1 = inlined_call_operand.hbm [shape: bf16[128,2048], index: 1, kind: input, shape index: {}]   ;;  %s2068_s2 = inlined_call_operand.hbm [shape: bf16[128,128], index: 2, kind: input, shape index: {}]   ;;  %s2069_s3 = inlined_call_operand.vmem [shape: f32[1,128], index: 3, kind: input, shape index: {}]   ;;  %s2070_s4 = inlined_call_operand.hbm [shape: f32[1,2048], index: 4, kind: input, shape index: {}]   ;;  %s2071_s5 = inlined_call_operand.hbm [shape: f32[16,2048], index: 5, kind: output, shape index: {}]  }
   0x1   :  { %2078 = sst [smem:[#allocation21_spill]] %s2066_s0 }
   0x2   :  { %2079 = sst [smem:[#allocation22_spill]] %s2067_s1 }
   0x3   :  { %2080 = sst [smem:[#allocation23_spill]] %s2068_s2 }
   0x4   :  { %10 = vsyncpa [#allocation4], 0 }
   0x5   :  { %11 = vsyncpa [#allocation7], 0 }
   0x6   :  { %13 = vsyncpa [#allocation7 + $0x1], 0 }
   0x7   :  { %14 = vsyncpa [#allocation10], 0 }
   0x8   :  { %16 = vsyncpa [#allocation10 + $0x1], 0 }
   0x9   :  { %17 = vsyncpa [#allocation5], 0 }
   0xa   :  { %19 = vsyncpa [#allocation5 + $0x1], 0  ;;  %s1744_s18 = smov 0   ;;  %s1746_s19 = smov 0  }
   0xb   :  { %s1748_s20 = smov 0   ;;  %s1750_s21 = smov 0  }
   0xc   :  { %s1752_s22 = smov 0   ;;  %s1754_s23 = smov 0  }
   0xd LB: > { %2081 = sst [smem:[#allocation17_spill]] %s1684_s20  ;;  %s1775_s24 = sadd.s32 4294967295, %s1696_s23   ;;  %s1696_s23 = sphi %s1754_s23, %s25_s23   ;;  %s1692_s22 = sphi %s1752_s22, %s2109_s22   ;;  %s1688_s21 = sphi %s1750_s21, %s2108_s21   ;;  %s1684_s20 = sphi %s1748_s20, %s2104_s20   ;;  %s1680_s19 = sphi %s1746_s19, %s2107_s19   ;;  %s1676_s18 = sphi %s1744_s18, %s2106_s18  }
   0xe   : > { %2082 = sst [smem:[#allocation18_spill]] %s1696_s23  ;;  %s1244_s25 = sadd.s32 4294967294, %s1696_s23  }
   0xf   : > { %s70_s26 = sadd.s32 1, %s1684_s20  ;;  %p77_p0 = scmp.ne.s32.totalorder %s1684_s20, %s1680_s19 }
  0x10   : > { %p78_p1 = scmp.eq.s32.totalorder %s1696_s23, 0  ;;  %p83_p2 = scmp.ne.s32.totalorder %s1680_s19, %s1676_s18 }
  0x11   : > { %p2072_p3 = scmp.eq.s32.totalorder %s1775_s24, 0  ;;  %p177_p4 = scmp.eq.s32.totalorder %s1775_s24, 1 }
  0x12   : > { %p1786_p5 = por %p78_p1, %p77_p0  ;;  %p183_p6 = scmp.eq.s32.totalorder %s1244_s25, 1 }
  0x13   : > { %p1792_p7 = por %p2072_p3, %p83_p2  ;;  %p1796_p8 = por %p177_p4, %p77_p0 }
  0x14   : > { %p1800_p9 = por %p183_p6, %p83_p2  ;;  %p1245_p10 = scmp.ge.s32.totalorder %s1696_s23, 1 }
  0x15   : > { %s2085_s29 = scalar_select %p1796_p8, 1, 0 }
  0x16   : > { %s2086_s30 = scalar_select %p1800_p9, 1, 0 }
  0x17   : > { %p190_p11 = scmp.lt.s32.totalorder %s1696_s23, 3  ;;  %s1698_s7 = smov [#allocation8]  }
  0x18   : > { %s218_s8 = sshll.u32 %s1698_s7, 4  ;;  %p1417_p0 = scmp.lt.s32.totalorder %s1696_s23, 2  ;;  %s219_s8 = int_to_ptr.vmem [resolvable:$true] %s218_s8 }
  0x19   : > { %p1806_p12 = pnand %p1245_p10, %p190_p11  ;;  %s1699_s11 = smov [#allocation3]  }
  0x1a   : > { %p1822_p2 = pnand %p1417_p0, %p1786_p5  ;;  %s205_s12 = sshll.u32 %s1699_s11, 4  ;;  %s206_s12 = int_to_ptr.vmem [resolvable:$true] %s205_s12 }
  0x1b   : > { %p1397_p1 = pneg %p1806_p12  ;;  %s1507_s13 = scalar_lea.vmem %s219_s8, 1024 }
  0x1c   : > { %p1508_p10 = scmp.ne.s32.totalorder %s219_s8, %s1507_s13  ;;  %p1515_p13 = scmp.lt.s32.totalorder %s219_s8, %s219_s8 }
  0x1d   : > { %p1816_p4 = pnand %p1397_p1, %p2072_p3  ;;  %p1516_p3 = scmp.lt.s32.totalorder %s1507_s13, %s1507_s13 }
  0x1f   : > { %p1498_p6 = pneg %p1816_p4  ;;  %p1517_p9 = por %p1516_p3, %p1515_p13 }
  0x21   : > { %p1510_p11 = pnand %p1508_p10, %p1498_p6 }
  0x23   : > { %p1511_p1 = pneg %p1510_p11 }
  0x25   : > { %p1518_p8 = pnand %p1517_p9, %p1511_p1 }
  0x27   : > { %1521 = shalt.err (!%p1518_p8)
}
  0x28   : > { %s1700_s14 = smov 64   ;;  %s1701_s15 = smov 4  }
  0x29   : > { %s2090_s2 = sld [smem:[#allocation23_spill]]  ;;  %s1533_s25 = scalar_lea.vmem %s206_s12, 128 }
  0x2a   : > { %p1534_p5 = scmp.ne.s32.totalorder %s206_s12, %s1533_s25  ;;  %p1541_p11 = scmp.lt.s32.totalorder %s206_s12, %s206_s12 }
  0x2b   : > { %p1542_p3 = scmp.lt.s32.totalorder %s1533_s25, %s1533_s25 }
  0x2c   : > { %p1536_p0 = pnand %p1534_p5, %p1498_p6 }
  0x2d   : > { %p1543_p9 = por %p1542_p3, %p1541_p11 }
  0x2e   : > { %p1537_p10 = pneg %p1536_p0 }
  0x2f   : > { %1403 = dma.hbm_to_vmem [thread:$0]  (!%p1816_p4), %s2090_s2, 1024, %s219_s8, [#allocation7], %s1700_s14, %s1700_s14, %s1701_s15  }
  0x30   : > { %p1544_p8 = pnand %p1543_p9, %p1537_p10 }
  0x32   : > { %1547 = shalt.err (!%p1544_p8)
}
  0x33   : > { %s2091_s0 = sld [smem:[#allocation21_spill]]  ;;  %s235_s8 = sand.u32 1, %s1696_s23  }
  0x34   : > { %s34_s11 = sadd.s32 1, %s1692_s22  ;;  %s1847_s13 = sand.u32 1, %s1684_s20  }
  0x35   : > { %p35_p13 = scmp.ge.s32.totalorder %s34_s11, 2  ;;  %s1249_s9 = sshll.u32 %s1847_s13, 9 }
  0x36   : > { %s1344_s16 = sshll.u32 %s1692_s22, 9  ;;  %s2093_s1 = sld [smem:[#allocation22_spill]] }
  0x37   : > { %s2111_s11 = smov (%p35_p13, %s34_s11), 0  ;;  %s239_s7 = scalar_lea.vmem [#allocation6], %s1249_s9 }
  0x38   : > { %2092 = sst [smem:[#allocation19_spill]] %s2111_s11  ;;  %p1550_p6 = pneg %p1822_p2 }
  0x39   : > { %1400 = dma.hbm_to_vmem [thread:$0]  (!%p1816_p4), %s2091_s0, 128, %s206_s12, [#allocation4], %s1700_s14, %s1700_s14, %s1701_s15  }
  0x3a   : > { %s246_s12 = sshll.u32 %s239_s7, 4  ;;  %s67_s14 = ssub.s32 %s1692_s22, %s2111_s11  ;;  %s247_s12 = int_to_ptr.vmem [resolvable:$true] %s246_s12 }
  0x3b   : > { %p68_p4 = scmp.eq.s32.totalorder %s67_s14, 0  ;;  %s236_s0 = scalar_lea.sflag [#allocation7], %s235_s8 }
  0x3c   : > { %s1856_s27 = scalar_lea.hbm %s2093_s1, %s1344_s16  ;;  %s1561_s2 = scalar_lea.vmem %s247_s12, 8192 }
  0x3d   : > { %s1863_s15 = scalar_select %p68_p4, %s1684_s20, %s70_s26  }
  0x3e   : > { %p1562_p1 = scmp.ne.s32.totalorder %s247_s12, %s1561_s2  ;;  %s1702_s17 = smov [#allocation6]  }
  0x3f   : > { %2094 = sst [smem:[#allocation20_spill]] %s1863_s15  ;;  %s1566_s16 = sshll.u32 %s1702_s17, 4  ;;  %s1567_s16 = int_to_ptr.vmem [resolvable:$false] %s1566_s16 }
  0x40   : > { %p1564_p5 = pnand %p1562_p1, %p1550_p6  ;;  %s1568_s9 = scalar_lea.vmem %s1567_s16, 16384 }
  0x41   : > { %p1569_p10 = scmp.lt.s32.totalorder %s247_s12, %s1567_s16  ;;  %p1570_p11 = scmp.lt.s32.totalorder %s1568_s9, %s1561_s2 }
  0x42   : > { %p1565_p0 = pneg %p1564_p5 }
  0x43   : > { %p1571_p3 = por %p1570_p11, %p1569_p10 }
  0x45   : > { %p1572_p9 = pnand %p1571_p3, %p1565_p0 }
  0x47   : > { %1575 = shalt.err (!%p1572_p9)
}
  0x48   : > { %s1703_s26 = smov 1024   ;;  %s1704_s8 = smov 512  }
  0x49   : > { %s1705_s25 = smov 32   ;;  %s1252_s7 = sshll.u32 %s1847_s13, 3 }
  0x4a   : > { %1407 = dma.hbm_to_vmem [thread:$0]  (!%p1822_p2), %s1856_s27, 8192, %s247_s12, %s236_s0, %s1703_s26, %s1704_s8, %s1705_s25  }
  0x4b   : > { %s1345_s14 = sshll.u32 %s1692_s22, 7  ;;  %s260_s16 = scalar_lea.vmem [#allocation9], %s1252_s7 }
  0x4c   : > { %s266_s2 = scalar_lea.hbm %s2070_s4, %s1345_s14  ;;  %s268_s9 = sshll.u32 %s260_s16, 4  ;;  %s269_s9 = int_to_ptr.vmem [resolvable:$true] %s268_s9 }
  0x4d   : > { %s257_s11 = scalar_lea.sflag [#allocation10], %s1847_s13  ;;  %s1589_s15 = scalar_lea.vmem %s269_s9, 128 }
  0x4e   : > { %p1590_p8 = scmp.ne.s32.totalorder %s269_s9, %s1589_s15  ;;  %s1706_s20 = smov [#allocation9]  }
  0x4f   : > { %s1594_s23 = sshll.u32 %s1706_s20, 4  ;;  %s1595_s23 = int_to_ptr.vmem [resolvable:$false] %s1594_s23 }
  0x50   : > { %p1592_p13 = pnand %p1590_p8, %p1550_p6  ;;  %s1596_s0 = scalar_lea.vmem %s1595_s23, 256 }
  0x51   : > { %p1597_p1 = scmp.lt.s32.totalorder %s269_s9, %s1595_s23  ;;  %p1598_p5 = scmp.lt.s32.totalorder %s1596_s0, %s1589_s15 }
  0x52   : > { %p1593_p4 = pneg %p1592_p13 }
  0x53   : > { %p1599_p0 = por %p1598_p5, %p1597_p1 }
  0x55   : > { %p1600_p10 = pnand %p1599_p0, %p1593_p4 }
  0x57   : > { %1603 = shalt.err (!%p1600_p10)
}
  0x58   : > { %1410 = dma.hbm_to_vmem [thread:$0]  (!%p1822_p2), %s266_s2, 128, %s269_s9, %s257_s11  }
  0x59   : > { %277 = sbr.rel (%p1806_p12) target bundleno = 645 (0x285), region = 40  ;;  %p2095_p11 = scmp.eq.s32.totalorder (!%p1806_p12), %s1775_s24, 0 }
  0x5e   : > { %1655 = dma.done.wait (%p2095_p11), [#allocation4], 128   ;;  %p2096_p6 = pmov %p2095_p11 }
  0x5f   : > { %s283_s1 = sand.u32 1, %s1775_s24   ;;  %s1892_s20 = sand.u32 1, %s1680_s19  }
  0x60   : > { %1657 = vsyncadd (%p2096_p6), [#allocation4], 4294967168  ;;  %s1257_s23 = sshll.u32 %s1892_s20, 9  ;;  %s284_s13 = scalar_lea.sflag [#allocation7], %s283_s1 }
  0x61   : > { %s1895_s10 = scalar_lea.vmem [#allocation6], %s1257_s23 }
  0x62   : > { %1659 = dma.done.wait (%p1792_p7), %s284_s13, 8192  }
  0x63   : > { %1661 = vsyncadd (%p1792_p7), %s284_s13, 4294959104  ;;  %p2097_p12 = pmov %p2096_p6 }
  0x64   : > { %p2098_p2 = pmov %p2096_p6 }
  0x65   : > { %1663 = dma.done.wait (%p2097_p12), [#allocation7], 1024  }
  0x66   : > { %1665 = vsyncadd (%p2098_p2), [#allocation7], 4294966272  ;;  %s1259_s6 = sshll.u32 %s1892_s20, 3  ;;  %s297_s11 = scalar_lea.sflag [#allocation10], %s1892_s20 }
  0x67   : > { %s1907_s27 = scalar_lea.vmem [#allocation9], %s1259_s6 }
  0x68   : > { %1667 = dma.done.wait (%p1792_p7), %s297_s11, 128  }
  0x69   : > { %1669 = vsyncadd (%p1792_p7), %s297_s11, 4294967168  ;;  %s1260_s12 = sshll.u32 %s1892_s20, 7  ;;  %p1261_p3 = scmp.ne.s32.totalorder %s1688_s21, 0 }
  0x6a   : > { %s1914_s15 = scalar_lea.vmem [#allocation11], %s1260_s12 }
  0x6b   : > { %341 = sbr.rel (%p1261_p3) target bundleno = 361 (0x169), region = 60 }
  0x70   : > { %v1482_v0 = vld [vmem:[#allocation8 + $0x38] sm:$0xff]   ;;  %v1707_v1 = vmov 0.0   ;;  %v1483_v2 = vld [vmem:[#allocation8 + $0x30] sm:$0xff]   ;;  %vm1708_vm0 = vmmov 0   ;;  %v1484_v3 = vld [vmem:[#allocation8 + $0x28] sm:$0xff]  }
  0x71   : > { %1363 = vmatprep.subr.bf16.mxu0 %v1707_v1  ;;  %1379 = vmatprep.mubr.msk.bf16.mxu0 %vm1708_vm0, %v1707_v1  ;;  %v1485_v4 = vld [vmem:[#allocation8 + $0x20] sm:$0xff]   ;;  %v1486_v5 = vld [vmem:[#allocation8 + $0x18] sm:$0xff]   ;;  %v1487_v6 = vld [vmem:[#allocation8 + $0x10] sm:$0xff]  }
  0x72   : > { %1364 = vmatpush3.bf16.msra.mxu0 %v1482_v0  ;;  %v1488_v7 = vld [vmem:[#allocation8 + $0x8] sm:$0xff]   ;;  %v1489_v8 = vld [vmem:[#allocation8] sm:$0xff]   ;;  %v1490_v9 = vld [vmem:[#allocation3] sm:$0xff]  }
  0x73   : > { %1365 = vmatprep.subr.bf16.mxu0 %v1707_v1  ;;  %v1262_v10 = vld [vmem:[%s2069_s3] ss:$0 sm:$0xff] }
  0x76   : > { %1366 = vmatpush3.bf16.msra.mxu0 %v1483_v2 }
  0x77   : > { %1367 = vmatprep.subr.bf16.mxu0 %v1707_v1 }
  0x7a   : > { %1368 = vmatpush3.bf16.msra.mxu0 %v1484_v3 }
  0x7b   : > { %1369 = vmatprep.subr.bf16.mxu0 %v1707_v1 }
  0x7e   : > { %1370 = vmatpush3.bf16.msra.mxu0 %v1485_v4 }
  0x7f   : > { %1371 = vmatprep.subr.bf16.mxu0 %v1707_v1 }
  0x82   : > { %1372 = vmatpush3.bf16.msra.mxu0 %v1486_v5 }
  0x83   : > { %1373 = vmatprep.subr.bf16.mxu0 %v1707_v1 }
  0x86   : > { %1374 = vmatpush3.bf16.msra.mxu0 %v1487_v6 }
  0x87   : > { %1375 = vmatprep.subr.bf16.mxu0 %v1707_v1 }
  0x8a   : > { %1376 = vmatpush3.bf16.msra.mxu0 %v1488_v7 }
  0x8b   : > { %1377 = vmatprep.subr.bf16.mxu0 %v1707_v1 }
  0x8e   : > { %1378 = vmatpush3.bf16.msra.mxu0 %v1489_v8 }
  0x91   : > { %1380 = vmatmul.mubr.bf16.vlgmr.msra.gmra.mxu0 %v1490_v9 }
 0x151   : > { %v455_v11 = vpop.f32.mrf.mxu0 }
 0x152   : > { %v456_v12 = vadd.f32 %v1262_v10, %v455_v11 }
 0x153   : > { %v1381_v13 = vpop.f32.mrf.mxu0 }
 0x154   : > { %1491 = vtanh.f32 %v456_v12 }
 0x155   : > { %v458_v14 = vpop.f32.mrf.mxu0 }
 0x156   : > { %v459_v15 = vadd.f32 %v1262_v10, %v458_v14 }
 0x157   : > { %v1382_v16 = vpop.f32.mrf.mxu0 }
 0x158   : > { %1493 = vtanh.f32 %v459_v15 }
 0x161   : > { %v1492_v17 = vpop.eup %1491 }
 0x165   : > { %v1494_v18 = vpop.eup %1493 }
 0x166   : > { %v1352_v19 = vpack.c.bf16 %v1494_v18, %v1492_v17 }
 0x168   : > { %1353 = vst [vmem:[#allocation2] sm:$0xff] %v1352_v19  }
 0x169 PF: > { %v532_v20 = vld [vmem:[%s1895_s10 + $0x1c0] sm:$0xff]  ;;  %v533_v22 = vld [vmem:[%s1895_s10 + $0x1c8] sm:$0xff]  ;;  %v1709_v28 = vmov 0   ;;  %v534_v19 = vld [vmem:[%s1895_s10 + $0x1d0] sm:$0xff]  ;;  %s1348_s26 = sshll.u32 %s1688_s21, 10  ;;  %s1113_s8 = sshll.u32 %s1914_s15, 4  ;;  %s2015_s8 = int_to_ptr.vmem [resolvable:$true] %s1113_s8 }
 0x16a   : > { %v536_v21 = vld [vmem:[%s1895_s10 + $0x1e0] sm:$0xff]  ;;  %v537_v24 = vld [vmem:[%s1895_s10 + $0x1e8] sm:$0xff]  ;;  %940 = vmatprep.mubr.bf16.mxu0 %v1709_v28  ;;  %983 = vmatprep.mubr.bf16.mxu1 %v1709_v28  ;;  %s2012_s14 = scalar_lea.hbm %s2071_s5, %s1348_s26  ;;  %s1097_s21 = scalar_lea.sflag [#allocation5], %s1892_s20 }
 0x16b   : > { %v1332_v23 = vcombine.high %v532_v20, %v536_v21  ;;  %v1331_v25 = vcombine.low %v532_v20, %v536_v21  ;;  %v524_v26 = vld [vmem:[%s1895_s10 + $0x180] sm:$0xff]  ;;  %v1334_v29 = vcombine.high %v533_v22, %v537_v24  ;;  %v1333_v30 = vcombine.low %v533_v22, %v537_v24  ;;  %v525_v32 = vld [vmem:[%s1895_s10 + $0x188] sm:$0xff]  ;;  %v538_v20 = vld [vmem:[%s1895_s10 + $0x1f0] sm:$0xff]  ;;  %s1604_s17 = scalar_lea.vmem %s2015_s8, 2048  ;;  %p2099_p9 = scmp.ne.s32.totalorder %s2085_s29, 0 }
 0x16c   : > { %v528_v27 = vld [vmem:[%s1895_s10 + $0x1a0] sm:$0xff]  ;;  %v529_v33 = vld [vmem:[%s1895_s10 + $0x1a8] sm:$0xff]  ;;  %v535_v21 = vld [vmem:[%s1895_s10 + $0x1d8] sm:$0xff]  ;;  %p1605_p7 = scmp.ne.s32.totalorder %s2015_s8, %s1604_s17  ;;  %s1710_s2 = smov [#allocation11]  }
 0x16d   : > { %v1324_v31 = vcombine.high %v524_v26, %v528_v27  ;;  %v516_v34 = vld [vmem:[%s1895_s10 + $0x140] sm:$0xff]  ;;  %908 = vmatprep.subr.bf16.mxu0 %v1332_v23  ;;  %v1326_v35 = vcombine.high %v525_v32, %v529_v33  ;;  %v517_v37 = vld [vmem:[%s1895_s10 + $0x148] sm:$0xff]  ;;  %951 = vmatprep.subr.bf16.mxu1 %v1334_v29  ;;  %v1323_v39 = vcombine.low %v524_v26, %v528_v27  ;;  %v539_v22 = vld [vmem:[%s1895_s10 + $0x1f8] sm:$0xff]  ;;  %s1608_s16 = sshll.u32 %s1710_s2, 4  ;;  %s1609_s16 = int_to_ptr.vmem [resolvable:$false] %s1608_s16 }
 0x16e   : > { %v520_v36 = vld [vmem:[%s1895_s10 + $0x160] sm:$0xff]  ;;  %v521_v38 = vld [vmem:[%s1895_s10 + $0x168] sm:$0xff]  ;;  %909 = vmatpush1.bf16.msra.mxu0 %v1331_v25  ;;  %952 = vmatpush1.bf16.msra.mxu1 %v1333_v30  ;;  %v1325_v40 = vcombine.low %v525_v32, %v529_v33  ;;  %v1336_v25 = vcombine.high %v534_v19, %v538_v20  ;;  %v1338_v26 = vcombine.high %v535_v21, %v539_v22  ;;  %v526_v27 = vld [vmem:[%s1895_s10 + $0x190] sm:$0xff]  ;;  %p1606_p8 = pnand %p1605_p7, %p2099_p9  ;;  %s1610_s9 = scalar_lea.vmem %s1609_s16, 4096 }
 0x16f   : > { %910 = vmatprep.subr.bf16.mxu0 %v1324_v31  ;;  %v1316_v41 = vcombine.high %v516_v34, %v520_v36  ;;  %953 = vmatprep.subr.bf16.mxu1 %v1326_v35  ;;  %v1318_v42 = vcombine.high %v517_v37, %v521_v38  ;;  %v508_v43 = vld [vmem:[%s1895_s10 + $0x100] sm:$0xff]  ;;  %v509_v45 = vld [vmem:[%s1895_s10 + $0x108] sm:$0xff]  ;;  %v1315_v47 = vcombine.low %v516_v34, %v520_v36  ;;  %v530_v29 = vld [vmem:[%s1895_s10 + $0x1b0] sm:$0xff]  ;;  %p1611_p4 = scmp.lt.s32.totalorder %s2015_s8, %s1609_s16  ;;  %p1612_p1 = scmp.lt.s32.totalorder %s1610_s9, %s1604_s17 }
 0x170   : > { %v512_v44 = vld [vmem:[%s1895_s10 + $0x120] sm:$0xff]  ;;  %v513_v46 = vld [vmem:[%s1895_s10 + $0x128] sm:$0xff]  ;;  %v1317_v48 = vcombine.low %v517_v37, %v521_v38  ;;  %v1960_v30 = vld [vmem:[#allocation2] sm:$0xff]   ;;  %v1335_v33 = vcombine.low %v534_v19, %v538_v20  ;;  %v1337_v34 = vcombine.low %v535_v21, %v539_v22  ;;  %v1328_v35 = vcombine.high %v526_v27, %v530_v29  ;;  %p1607_p13 = pneg %p1606_p8 }
 0x171   : > { %v1308_v49 = vcombine.high %v508_v43, %v512_v44  ;;  %v1310_v50 = vcombine.high %v509_v45, %v513_v46  ;;  %v500_v51 = vld [vmem:[%s1895_s10 + $0xc0] sm:$0xff]  ;;  %v501_v53 = vld [vmem:[%s1895_s10 + $0xc8] sm:$0xff]  ;;  %v1307_v55 = vcombine.low %v508_v43, %v512_v44  ;;  %v1309_v56 = vcombine.low %v509_v45, %v513_v46  ;;  %v527_v31 = vld [vmem:[%s1895_s10 + $0x198] sm:$0xff]  ;;  %p1613_p5 = por %p1612_p1, %p1611_p4 }
 0x172   : > { %911 = vmatpush1.bf16.msra.mxu0 %v1323_v39  ;;  %954 = vmatpush1.bf16.msra.mxu1 %v1325_v40  ;;  %v504_v52 = vld [vmem:[%s1895_s10 + $0xe0] sm:$0xff]  ;;  %v505_v54 = vld [vmem:[%s1895_s10 + $0xe8] sm:$0xff]  ;;  %v531_v32 = vld [vmem:[%s1895_s10 + $0x1b8] sm:$0xff]  ;;  %v542_v22 = vlaneseq }
 0x173   : > { %912 = vmatprep.subr.bf16.mxu0 %v1316_v41  ;;  %955 = vmatprep.subr.bf16.mxu1 %v1318_v42  ;;  %v1300_v57 = vcombine.high %v500_v51, %v504_v52  ;;  %v1302_v58 = vcombine.high %v501_v53, %v505_v54  ;;  %v492_v59 = vld [vmem:[%s1895_s10 + $0x80] sm:$0xff]  ;;  %v493_v61 = vld [vmem:[%s1895_s10 + $0x88] sm:$0xff]  ;;  %v1299_v63 = vcombine.low %v500_v51, %v504_v52  ;;  %v518_v37 = vld [vmem:[%s1895_s10 + $0x150] sm:$0xff]  ;;  %p1614_p0 = pnand %p1613_p5, %p1607_p13 }
 0x174   : > { %v496_v60 = vld [vmem:[%s1895_s10 + $0xa0] sm:$0xff]  ;;  %v497_v62 = vld [vmem:[%s1895_s10 + $0xa8] sm:$0xff]  ;;  %v1301_v0 = vcombine.low %v501_v53, %v505_v54  ;;  %v1330_v36 = vcombine.high %v527_v31, %v531_v32  ;;  %v522_v38 = vld [vmem:[%s1895_s10 + $0x170] sm:$0xff]  ;;  %v1327_v41 = vcombine.low %v526_v27, %v530_v29  ;;  %v1329_v42 = vcombine.low %v527_v31, %v531_v32 }
 0x175   : > { %v1292_v1 = vcombine.high %v492_v59, %v496_v60  ;;  %v1294_v2 = vcombine.high %v493_v61, %v497_v62  ;;  %v484_v3 = vld [vmem:[%s1895_s10 + $0x40] sm:$0xff]  ;;  %v485_v5 = vld [vmem:[%s1895_s10 + $0x48] sm:$0xff]  ;;  %v1291_v7 = vcombine.low %v492_v59, %v496_v60  ;;  %v1293_v8 = vcombine.low %v493_v61, %v497_v62  ;;  %v519_v39 = vld [vmem:[%s1895_s10 + $0x158] sm:$0xff] }
 0x176   : > { %913 = vmatpush1.bf16.msra.mxu0 %v1315_v47  ;;  %956 = vmatpush1.bf16.msra.mxu1 %v1317_v48  ;;  %v488_v4 = vld [vmem:[%s1895_s10 + $0x60] sm:$0xff]  ;;  %v489_v6 = vld [vmem:[%s1895_s10 + $0x68] sm:$0xff]  ;;  %v523_v40 = vld [vmem:[%s1895_s10 + $0x178] sm:$0xff]  ;;  %v1320_v43 = vcombine.high %v518_v37, %v522_v38 }
 0x177   : > { %914 = vmatprep.subr.bf16.mxu0 %v1308_v49  ;;  %957 = vmatprep.subr.bf16.mxu1 %v1310_v50  ;;  %v1284_v9 = vcombine.high %v484_v3, %v488_v4  ;;  %v1286_v10 = vcombine.high %v485_v5, %v489_v6  ;;  %v476_v11 = vld [vmem:[%s1895_s10] sm:$0xff]  ;;  %v477_v13 = vld [vmem:[%s1895_s10 + $0x8] sm:$0xff]  ;;  %v1283_v15 = vcombine.low %v484_v3, %v488_v4  ;;  %v510_v45 = vld [vmem:[%s1895_s10 + $0x110] sm:$0xff] }
 0x178   : > { %v480_v12 = vld [vmem:[%s1895_s10 + $0x20] sm:$0xff]  ;;  %v481_v14 = vld [vmem:[%s1895_s10 + $0x28] sm:$0xff]  ;;  %v1285_v16 = vcombine.low %v485_v5, %v489_v6  ;;  %v1322_v44 = vcombine.high %v519_v39, %v523_v40  ;;  %v514_v46 = vld [vmem:[%s1895_s10 + $0x130] sm:$0xff]  ;;  %v1319_v49 = vcombine.low %v518_v37, %v522_v38  ;;  %v1321_v50 = vcombine.low %v519_v39, %v523_v40 }
 0x179   : > { %v1276_v17 = vcombine.high %v476_v11, %v480_v12  ;;  %v1278_v18 = vcombine.high %v477_v13, %v481_v14  ;;  %v1275_v23 = vcombine.low %v476_v11, %v480_v12  ;;  %v1277_v24 = vcombine.low %v477_v13, %v481_v14  ;;  %v511_v47 = vld [vmem:[%s1895_s10 + $0x118] sm:$0xff]  ;;  %v502_v53 = vld [vmem:[%s1895_s10 + $0xd0] sm:$0xff] }
 0x17a   : > { %915 = vmatpush1.bf16.msra.mxu0 %v1307_v55  ;;  %958 = vmatpush1.bf16.msra.mxu1 %v1309_v56  ;;  %v515_v48 = vld [vmem:[%s1895_s10 + $0x138] sm:$0xff]  ;;  %v1312_v51 = vcombine.high %v510_v45, %v514_v46  ;;  %v506_v54 = vld [vmem:[%s1895_s10 + $0xf0] sm:$0xff] }
 0x17b   : > { %916 = vmatprep.subr.bf16.mxu0 %v1300_v57  ;;  %959 = vmatprep.subr.bf16.mxu1 %v1302_v58  ;;  %v1314_v52 = vcombine.high %v511_v47, %v515_v48  ;;  %v503_v55 = vld [vmem:[%s1895_s10 + $0xd8] sm:$0xff]  ;;  %v1311_v57 = vcombine.low %v510_v45, %v514_v46  ;;  %v1304_v58 = vcombine.high %v502_v53, %v506_v54  ;;  %v494_v60 = vld [vmem:[%s1895_s10 + $0x90] sm:$0xff] }
 0x17c   : > { %v507_v56 = vld [vmem:[%s1895_s10 + $0xf8] sm:$0xff]  ;;  %v498_v61 = vld [vmem:[%s1895_s10 + $0xb0] sm:$0xff] }
 0x17d   : > { %v1306_v59 = vcombine.high %v503_v55, %v507_v56  ;;  %v495_v62 = vld [vmem:[%s1895_s10 + $0x98] sm:$0xff]  ;;  %v486_v4 = vld [vmem:[%s1895_s10 + $0x50] sm:$0xff] }
 0x17e   : > { %917 = vmatpush1.bf16.msra.mxu0 %v1299_v63  ;;  %960 = vmatpush1.bf16.msra.mxu1 %v1301_v0  ;;  %v499_v63 = vld [vmem:[%s1895_s10 + $0xb8] sm:$0xff]  ;;  %v1303_v0 = vcombine.low %v502_v53, %v506_v54  ;;  %v490_v5 = vld [vmem:[%s1895_s10 + $0x70] sm:$0xff] }
 0x17f   : > { %918 = vmatprep.subr.bf16.mxu0 %v1292_v1  ;;  %961 = vmatprep.subr.bf16.mxu1 %v1294_v2  ;;  %v1305_v1 = vcombine.low %v503_v55, %v507_v56  ;;  %v1296_v2 = vcombine.high %v494_v60, %v498_v61  ;;  %v1298_v3 = vcombine.high %v495_v62, %v499_v63  ;;  %v487_v6 = vld [vmem:[%s1895_s10 + $0x58] sm:$0xff]  ;;  %v478_v12 = vld [vmem:[%s1895_s10 + $0x10] sm:$0xff] }
 0x180   : > { %v482_v13 = vld [vmem:[%s1895_s10 + $0x30] sm:$0xff]  ;;  %v479_v14 = vld [vmem:[%s1895_s10 + $0x18] sm:$0xff] }
 0x181   : > { %v1279_v20 = vcombine.low %v478_v12, %v482_v13 }
 0x182   : > { %919 = vmatpush1.bf16.msra.mxu0 %v1291_v7  ;;  %962 = vmatpush1.bf16.msra.mxu1 %v1293_v8  ;;  %v491_v7 = vld [vmem:[%s1895_s10 + $0x78] sm:$0xff]  ;;  %v1295_v8 = vcombine.low %v494_v60, %v498_v61 }
 0x183   : > { %920 = vmatprep.subr.bf16.mxu0 %v1284_v9  ;;  %963 = vmatprep.subr.bf16.mxu1 %v1286_v10  ;;  %v1297_v9 = vcombine.low %v495_v62, %v499_v63  ;;  %v1288_v10 = vcombine.high %v486_v4, %v490_v5  ;;  %v1290_v11 = vcombine.high %v487_v6, %v491_v7 }
 0x186   : > { %921 = vmatpush1.bf16.msra.mxu0 %v1283_v15  ;;  %964 = vmatpush1.bf16.msra.mxu1 %v1285_v16  ;;  %v483_v15 = vld [vmem:[%s1895_s10 + $0x38] sm:$0xff]  ;;  %v1287_v16 = vcombine.low %v486_v4, %v490_v5 }
 0x187   : > { %922 = vmatprep.subr.bf16.mxu0 %v1276_v17  ;;  %965 = vmatprep.subr.bf16.mxu1 %v1278_v18  ;;  %v1289_v17 = vcombine.low %v487_v6, %v491_v7  ;;  %v1280_v18 = vcombine.high %v478_v12, %v482_v13  ;;  %v1282_v19 = vcombine.high %v479_v14, %v483_v15 }
 0x188   : > { %v1281_v21 = vcombine.low %v479_v14, %v483_v15 }
 0x18a   : > { %923 = vmatpush1.bf16.msra.mxu0 %v1275_v23  ;;  %966 = vmatpush1.bf16.msra.mxu1 %v1277_v24  ;;  %v543_v23 = vshrl.u32 %v542_v22, 7 }
 0x18b   : > { %994 = vmatprep.subr.bf16.mxu0 %v1336_v25  ;;  %1037 = vmatprep.subr.bf16.mxu1 %v1338_v26  ;;  %v540_v25 = vld [vmem:[%s1907_s27] sm:$0xff] }
 0x18c   : > { %v544_v24 = vsub.s32 0, %v543_v23  ;;  %v552_v26 = vsub.s32 2, %v543_v23  ;;  %v548_v27 = vsub.s32 1, %v543_v23  ;;  %v556_v29 = vsub.s32 3, %v543_v23 }
 0x18d   : > { %941 = vmatmul.mubr.bf16.vlgmr.msra.gmra.mxu0 %v1960_v30  ;;  %984 = vmatmul.mubr.bf16.vlgmr.msra.gmra.mxu1 %v1960_v30  ;;  %v572_v53 = vsub.s32 7, %v543_v23 }
 0x18e   : > { %995 = vmatpush1.bf16.msra.mxu0 %v1335_v33  ;;  %1038 = vmatpush1.bf16.msra.mxu1 %v1337_v34  ;;  %v545_v31 = vrot.slane %v540_v25, %v544_v24  ;;  %v553_v32 = vrot.slane %v540_v25, %v552_v26  ;;  %v549_v33 = vrot.slane %v540_v25, %v548_v27 }
 0x18f   : > { %996 = vmatprep.subr.bf16.mxu0 %v1328_v35  ;;  %1039 = vmatprep.subr.bf16.mxu1 %v1330_v36  ;;  %v557_v35 = vrot.slane %v540_v25, %v556_v29 }
 0x190   : > { %1026 = vmatprep.mubr.bf16.mxu0 %v1709_v28  ;;  %1069 = vmatprep.mubr.bf16.mxu1 %v1709_v28  ;;  %v1313_v28 = vcombine.low %v511_v47, %v515_v48 }
 0x192   : > { %997 = vmatpush1.bf16.msra.mxu0 %v1327_v41  ;;  %1040 = vmatpush1.bf16.msra.mxu1 %v1329_v42 }
 0x193   : > { %998 = vmatprep.subr.bf16.mxu0 %v1320_v43  ;;  %1041 = vmatprep.subr.bf16.mxu1 %v1322_v44 }
 0x196   : > { %999 = vmatpush1.bf16.msra.mxu0 %v1319_v49  ;;  %1042 = vmatpush1.bf16.msra.mxu1 %v1321_v50  ;;  %v560_v50 = vsub.s32 4, %v543_v23 }
 0x197   : > { %1000 = vmatprep.subr.bf16.mxu0 %v1312_v51  ;;  %1043 = vmatprep.subr.bf16.mxu1 %v1314_v52  ;;  %v568_v51 = vsub.s32 6, %v543_v23  ;;  %v564_v52 = vsub.s32 5, %v543_v23 }
 0x198   : > { %v561_v54 = vrot.slane %v540_v25, %v560_v50 }
 0x199   : > { %v569_v55 = vrot.slane %v540_v25, %v568_v51  ;;  %v565_v56 = vrot.slane %v540_v25, %v564_v52 }
 0x19a   : > { %1001 = vmatpush1.bf16.msra.mxu0 %v1311_v57  ;;  %1044 = vmatpush1.bf16.msra.mxu1 %v1313_v28  ;;  %v573_v28 = vrot.slane %v540_v25, %v572_v53 }
 0x19b   : > { %1002 = vmatprep.subr.bf16.mxu0 %v1304_v58  ;;  %1045 = vmatprep.subr.bf16.mxu1 %v1306_v59 }
 0x19e   : > { %1003 = vmatpush1.bf16.msra.mxu0 %v1303_v0  ;;  %1046 = vmatpush1.bf16.msra.mxu1 %v1305_v1 }
 0x19f   : > { %1004 = vmatprep.subr.bf16.mxu0 %v1296_v2  ;;  %1047 = vmatprep.subr.bf16.mxu1 %v1298_v3 }
 0x1a2   : > { %1005 = vmatpush1.bf16.msra.mxu0 %v1295_v8  ;;  %1048 = vmatpush1.bf16.msra.mxu1 %v1297_v9 }
 0x1a3   : > { %1006 = vmatprep.subr.bf16.mxu0 %v1288_v10  ;;  %1049 = vmatprep.subr.bf16.mxu1 %v1290_v11 }
 0x1a6   : > { %1007 = vmatpush1.bf16.msra.mxu0 %v1287_v16  ;;  %1050 = vmatpush1.bf16.msra.mxu1 %v1289_v17 }
 0x1a7   : > { %1008 = vmatprep.subr.bf16.mxu0 %v1280_v18  ;;  %1051 = vmatprep.subr.bf16.mxu1 %v1282_v19 }
 0x1aa   : > { %1009 = vmatpush1.bf16.msra.mxu0 %v1279_v20  ;;  %1052 = vmatpush1.bf16.msra.mxu1 %v1281_v21 }
 0x1ad   : > { %1027 = vmatmul.mubr.bf16.vlgmr.msra.gmra.mxu0 %v1960_v30  ;;  %1070 = vmatmul.mubr.bf16.vlgmr.msra.gmra.mxu1 %v1960_v30 }
 0x24d   : > { %v942_v34 = vpop.f32.mrf.mxu0  ;;  %v985_v37 = vpop.f32.mrf.mxu1 }
 0x24e   : > { %v943_v36 = vadd.f32 %v942_v34, %v545_v31  ;;  %v986_v30 = vadd.f32 %v985_v37, %v553_v32 }
 0x24f   : > { %v944_v38 = vpop.f32.mrf.mxu0  ;;  %v987_v40 = vpop.f32.mrf.mxu1 }
 0x250   : > { %1080 = vst [vmem:[%s1914_s15] sm:$0xff] %v943_v36  ;;  %v945_v39 = vadd.f32 %v944_v38, %v549_v33  ;;  %1082 = vst [vmem:[%s1914_s15 + $0x10] sm:$0xff] %v986_v30  ;;  %v988_v41 = vadd.f32 %v987_v40, %v557_v35 }
 0x251   : > { %v946_v42 = vpop.f32.mrf.mxu0  ;;  %v989_v44 = vpop.f32.mrf.mxu1 }
 0x252   : > { %1081 = vst [vmem:[%s1914_s15 + $0x8] sm:$0xff] %v945_v39  ;;  %v947_v43 = vadd.f32 %v946_v42, %v545_v31  ;;  %1083 = vst [vmem:[%s1914_s15 + $0x18] sm:$0xff] %v988_v41  ;;  %v990_v45 = vadd.f32 %v989_v44, %v553_v32 }
 0x253   : > { %v948_v46 = vpop.f32.mrf.mxu0  ;;  %v991_v48 = vpop.f32.mrf.mxu1 }
 0x254   : > { %1088 = vst [vmem:[%s1914_s15 + $0x40] sm:$0xff] %v947_v43  ;;  %v949_v47 = vadd.f32 %v948_v46, %v549_v33  ;;  %1090 = vst [vmem:[%s1914_s15 + $0x50] sm:$0xff] %v990_v45  ;;  %v992_v49 = vadd.f32 %v991_v48, %v557_v35 }
 0x256   : > { %1089 = vst [vmem:[%s1914_s15 + $0x48] sm:$0xff] %v949_v47  ;;  %1091 = vst [vmem:[%s1914_s15 + $0x58] sm:$0xff] %v992_v49 }
 0x26d   : > { %v1028_v57 = vpop.f32.mrf.mxu0  ;;  %v1071_v59 = vpop.f32.mrf.mxu1 }
 0x26e   : > { %v1029_v58 = vadd.f32 %v1028_v57, %v561_v54  ;;  %v1072_v60 = vadd.f32 %v1071_v59, %v569_v55 }
 0x26f   : > { %v1030_v61 = vpop.f32.mrf.mxu0  ;;  %v1073_v63 = vpop.f32.mrf.mxu1 }
 0x270   : > { %1084 = vst [vmem:[%s1914_s15 + $0x20] sm:$0xff] %v1029_v58  ;;  %v1031_v62 = vadd.f32 %v1030_v61, %v565_v56  ;;  %1086 = vst [vmem:[%s1914_s15 + $0x30] sm:$0xff] %v1072_v60  ;;  %v1074_v0 = vadd.f32 %v1073_v63, %v573_v28 }
 0x271   : > { %v1032_v1 = vpop.f32.mrf.mxu0  ;;  %v1075_v3 = vpop.f32.mrf.mxu1 }
 0x272   : > { %1085 = vst [vmem:[%s1914_s15 + $0x28] sm:$0xff] %v1031_v62  ;;  %v1033_v2 = vadd.f32 %v1032_v1, %v561_v54  ;;  %1087 = vst [vmem:[%s1914_s15 + $0x38] sm:$0xff] %v1074_v0  ;;  %v1076_v4 = vadd.f32 %v1075_v3, %v569_v55 }
 0x273   : > { %v1034_v5 = vpop.f32.mrf.mxu0  ;;  %v1077_v7 = vpop.f32.mrf.mxu1 }
 0x274   : > { %1092 = vst [vmem:[%s1914_s15 + $0x60] sm:$0xff] %v1033_v2  ;;  %v1035_v6 = vadd.f32 %v1034_v5, %v565_v56  ;;  %1094 = vst [vmem:[%s1914_s15 + $0x70] sm:$0xff] %v1076_v4  ;;  %v1078_v8 = vadd.f32 %v1077_v7, %v573_v28 }
 0x276   : > { %1093 = vst [vmem:[%s1914_s15 + $0x68] sm:$0xff] %v1035_v6  ;;  %1095 = vst [vmem:[%s1914_s15 + $0x78] sm:$0xff] %v1078_v8 }
 0x277   : > { %1617 = shalt.err (!%p1614_p0)
}
 0x278   : > { %s1618_s0 = scalar_lea.hbm %s2012_s14, 2048  ;;  %s1622_s13 = scalar_lea.hbm %s2071_s5, 4096 }
 0x279   : > { %p1619_p10 = scmp.ne.s32.totalorder %s2012_s14, %s1618_s0  ;;  %p1623_p12 = scmp.lt.s32.totalorder %s2012_s14, %s2071_s5 }
 0x27a   : > { %p1624_p2 = scmp.lt.s32.totalorder %s1622_s13, %s1618_s0 }
 0x27b   : > { %p1620_p11 = pnand %p1619_p10, %p2099_p9 }
 0x27c   : > { %p1625_p3 = por %p1624_p2, %p1623_p12 }
 0x27d   : > { %p1621_p6 = pneg %p1620_p11 }
 0x27f   : > { %p1626_p7 = pnand %p1625_p3, %p1621_p6 }
 0x281   : > { %1629 = shalt.err (!%p1626_p7)
}
 0x282   : > { %s1711_s11 = smov 1024   ;;  %s1712_s27 = smov 2048  }
 0x283   : > { %s1713_s12 = smov 64  }
 0x284   : > { %1395 = dma.vmem_to_hbm [thread:$0]  (%p2099_p9), %s2015_s8, 2048, %s2012_s14, %s1097_s21, %s1711_s11, %s1712_s27, %s1713_s12  }
 0x285 PF: > { %s2100_s15 = sld [smem:[#allocation18_spill]]  ;;  %s1128_s24 = sand.u32 1, %s1676_s18  }
 0x286   : > { %p2101_p8 = scmp.ne.s32.totalorder %s2086_s30, 0  ;;  %s1129_s28 = scalar_lea.sflag [#allocation5], %s1128_s24 }
 0x28b   : > { %p2102_p13 = scmp.ge.s32.totalorder %s2100_s15, 2 }
 0x28d   : > { %p1412_p4 = pnand %p2102_p13, %p2101_p8 }
 0x28f   : > { %p1413_p1 = pneg %p1412_p4 }
 0x291   : > { %1671 = dma.done.wait (%p1413_p1), %s1129_s28, 2048  }
 0x292   : > { %1673 = vsyncadd (%p1413_p1), %s1129_s28, 4294965248  ;;  %s25_s23 = sadd.s32 1, %s2100_s15   ;;  %s2103_s26 = sld [smem:[#allocation17_spill]] }
 0x293   : > { %p22_p5 = scmp.ge.s32.totalorder %s25_s23, 4   ;;  %s2104_s20 = sld [smem:[#allocation20_spill]] }
 0x294   : > { %s2105_s29 = sld [smem:[#allocation19_spill]]  ;;  %s2106_s18 = smov %s1680_s19 }
 0x295   : > { %s2108_s21 = smov %s1692_s22 }
 0x296   :  { %24 = sbr.rel (!%p22_p5) target bundleno = 13 (0xd), region = 112 }
 0x298   : > { %s2107_s19 = smov %s2103_s26 }
 0x29a   : > { %s2109_s22 = smov %s2105_s29 }
 0x29b   :  { %1134 = vsyncpa [#allocation4], 1 }
 0x29c   :  { %1136 = vsyncpa [#allocation4 + $0x1], 1 }
 0x29d   :  { %1137 = vsyncpa [#allocation7], 1 }
 0x29e   :  { %1139 = vsyncpa [#allocation7 + $0x1], 1 }
 0x29f   :  { %1140 = vsyncpa [#allocation10], 1 }
 0x2a0   :  { %1142 = vsyncpa [#allocation10 + $0x1], 1 }
 0x2a1   :  { %1143 = vsyncpa [#allocation5], 1 }
 0x2a2   :  { %1145 = vsyncpa [#allocation5 + $0x1], 1 }

</bundles_post_ra>
